<compile_context>
chip_gen: v6e
topology: v6e:2x2x1
jax: 0.10.0
libtpu: 0.0.40
codegen_flags: <defaults>
</compile_context>

<pallas_src>
import functools

import numpy as np
import jax
import jax.numpy as jnp
from jax import lax
from jax.experimental import pallas as pl
from jax.experimental.pallas import tpu as pltpu

SIGMA = 1e-4                                            # BlendParams.sigma
INV_SIGMA = 1.0 / SIGMA
BLUR_RADIUS = float(np.log(1.0 / 1e-4 - 1.0) * 1e-4)    # threshold on *squared* NDC dist
CULL_RADIUS = float(np.sqrt(BLUR_RADIUS)) + 1e-6        # influence radius in NDC (+ margin)
COEF_STRIDE = 16                                        # f32 slots per face in SMEM table


# --------------------------- soft rasterizer kernel -------------------------
def _raster_kernel(counts_ref, ids_ref,               # scalar-prefetch (SMEM, int32)
                   coef_ref,                          # per-face coefficients (SMEM, f32)
                   sil_ref,                           # (TS, TL) silhouette tile (VMEM out)
                   *, H, W, TS, TL, IDS_W):
    # TRANSPOSED layout: sublane axis = image width (W), lane axis = image height (H).
    i = pl.program_id(0)                              # tile along image width  (sublanes)
    j = pl.program_id(1)                              # tile along image height (lanes)
    n_tj = pl.num_programs(1)
    tile_idx = i * n_tj + j

    col = i * TS + lax.broadcasted_iota(jnp.int32, (TS, TL), 0)   # original W (x) index
    row = j * TL + lax.broadcasted_iota(jnp.int32, (TS, TL), 1)   # original H (y) index
    # pixel centers in NDC-like [-1, 1] coordinates of the TRUE (unpadded) image
    px = (col.astype(jnp.float32) + 0.5) * (2.0 / float(W)) - 1.0
    py = (row.astype(jnp.float32) + 0.5) * (2.0 / float(H)) - 1.0

    def face_factor(fid):
        base = fid * COEF_STRIDE

        def edge(off):
            # edge k: start (xk, yk), vector (exk, eyk), iek = 1/(|e_k|^2 + eps)
            xk = coef_ref[base + off + 0]
            yk = coef_ref[base + off + 1]
            exk = coef_ref[base + off + 2]
            eyk = coef_ref[base + off + 3]
            iek = coef_ref[base + off + 4]
            dx = px - xk
            dy = py - yk
            # squared distance pixel -> edge segment (divide hoisted into iek)
            t = jnp.clip((dx * exk + dy * eyk) * iek, 0.0, 1.0)
            qx = dx - t * exk
            qy = dy - t * eyk
            d2 = qx * qx + qy * qy
            # edge function (inside test)
            ck = exk * dy - eyk * dx
            return d2, ck

        d0, c0 = edge(0)
        d1, c1 = edge(5)
        d2, c2 = edge(10)

        min_d = jnp.minimum(jnp.minimum(d0, d1), d2)
        inside = ((jnp.minimum(jnp.minimum(c0, c1), c2) >= 0.0)
                  | (jnp.maximum(jnp.maximum(c0, c1), c2) <= 0.0))
        signed = jnp.where(inside, -min_d, min_d)       # signed squared distance

        # 1 - sigmoid(-x) == sigmoid(x); evaluate sigmoid via exp (EUP) + approx
        # reciprocal (EUP) so the divide stays off the saturated VALU slot.
        # Clamp the exp argument so it never overflows to inf (both where()
        # branches are evaluated).
        nx = jnp.minimum(signed * (-INV_SIGMA), 30.0)   # -x, clamped: exp(30) finite
        sig = pl.reciprocal(1.0 + jnp.exp(nx), approx=True)
        # far faces contribute factor exactly 1
        return jnp.where(signed <= BLUR_RADIUS, sig, 1.0)

    n_faces = counts_ref[tile_idx]
    idbase = tile_idx * IDS_W

    # one face per iteration (spill-safe; scalar-load latency is not the bottleneck)
    def body(k, prod):
        return prod * face_factor(ids_ref[idbase + k])

    prod = lax.fori_loop(0, n_faces, body, jnp.ones((TS, TL), jnp.float32))
    sil_ref[...] = 1.0 - prod


# --------------------------------- wrapper ----------------------------------
def silhouette_loss(verts, gt, R, face, *, focal=1000.0, c=512.0, TS=8, TL=256):
    H, W = gt.shape
    gt = gt.astype(jnp.float32)

    # 1) rotation (torch.mm(R, verts.T).T) + pinhole projection to NDC-like coords.
    verts_rot = verts.astype(jnp.float32) @ R.astype(jnp.float32).T
    X, Y, Z = verts_rot[:, 0], verts_rot[:, 1], verts_rot[:, 2]
    x_ndc = (focal * X / Z + c) / 1024.0 * 2.0 - 1.0
    y_ndc = (focal * Y / Z + c) / 1024.0 * 2.0 - 1.0
    proj = jnp.stack([x_ndc, y_ndc], axis=-1)                     # (V, 2)

    F_FACES = face.shape[0]
    tri = proj[face].astype(jnp.float32)                          # (F, 3, 2)

    # far-away dummy triangle: valid coef-table entry for padded face ids (factor == 1)
    dummy = jnp.array([[[1e3, 1e3], [1e3 + 1.0, 1e3], [1e3, 1e3 + 1.0]]], jnp.float32)
    tri_all = jnp.concatenate([tri, dummy], axis=0)               # (F+1, 3, 2)

    # per-face / per-edge coefficients -> flat f32 SMEM table (COEF_STRIDE per face)
    starts = tri_all                                              # edge k starts at vtx k
    evec = jnp.roll(tri_all, -1, axis=1) - starts                 # ... ends at vtx k+1
    inv_ee = 1.0 / (jnp.sum(evec * evec, axis=-1) + 1e-12)        # (F+1, 3)
    coef = jnp.concatenate([starts, evec, inv_ee[..., None]], axis=-1)   # (F+1, 3, 5)
    coef = coef.reshape(F_FACES + 1, 15)
    coef = jnp.pad(coef, ((0, 0), (0, COEF_STRIDE - 15)))
    coef_flat = coef.reshape(-1).astype(jnp.float32)              # ((F+1)*16,)

    # 2) transposed / padded raster extents: sublane axis = W, lane axis = H
    n_ti = pl.cdiv(W, TS)                                         # tiles along width
    n_tj = pl.cdiv(H, TL)                                         # tiles along height
    Wp, Hp = n_ti * TS, n_tj * TL
    n_tiles = n_ti * n_tj

    # per-tile face culling: faces whose bbox (expanded by the blur influence radius)
    # misses a tile contribute factor exactly 1 -> skip them in the kernel.
    fx_min = tri[..., 0].min(axis=1); fx_max = tri[..., 0].max(axis=1)
    fy_min = tri[..., 1].min(axis=1); fy_max = tri[..., 1].max(axis=1)

    ti = jnp.arange(n_ti, dtype=jnp.float32)
    tj = jnp.arange(n_tj, dtype=jnp.float32)
    px_lo = (ti * TS + 0.5) / float(W) * 2.0 - 1.0
    px_hi = (ti * TS + (TS - 1) + 0.5) / float(W) * 2.0 - 1.0
    py_lo = (tj * TL + 0.5) / float(H) * 2.0 - 1.0
    py_hi = (tj * TL + (TL - 1) + 0.5) / float(H) * 2.0 - 1.0

    ovl_x = ((fx_min[None, :] - CULL_RADIUS <= px_hi[:, None])
             & (fx_max[None, :] + CULL_RADIUS >= px_lo[:, None]))         # (n_ti, F)
    ovl_y = ((fy_min[None, :] - CULL_RADIUS <= py_hi[:, None])
             & (fy_max[None, :] + CULL_RADIUS >= py_lo[:, None]))         # (n_tj, F)
    overlap = (ovl_x[:, None, :] & ovl_y[None, :, :]).reshape(n_tiles, F_FACES)

    counts = jnp.sum(overlap, axis=-1).astype(jnp.int32)                  # (n_tiles,)
    order = jnp.argsort(jnp.logical_not(overlap), axis=-1).astype(jnp.int32)
    pos = jnp.arange(F_FACES, dtype=jnp.int32)[None, :]
    ids = jnp.where(pos < counts[:, None], order, F_FACES)                # pad w/ dummy id
    ids_flat = ids.reshape(-1)                                            # (n_tiles*F,)
    IDS_W = F_FACES

    kernel = functools.partial(_raster_kernel, H=H, W=W, TS=TS, TL=TL, IDS_W=IDS_W)

    sil_t = pl.pallas_call(
        kernel,
        out_shape=jax.ShapeDtypeStruct((Wp, Hp), jnp.float32),            # transposed
        grid_spec=pltpu.PrefetchScalarGridSpec(
            num_scalar_prefetch=2,                                        # counts, ids
            grid=(n_ti, n_tj),
            in_specs=[pl.BlockSpec(memory_space=pltpu.MemorySpace.SMEM)], # face coefs
            out_specs=pl.BlockSpec((TS, TL), lambda i, j, *_: (i, j))),   # lane-dense tile
        compiler_params=pltpu.CompilerParams(
            dimension_semantics=("parallel", "parallel")),
    )(counts, ids_flat, coef_flat)

    sil = sil_t[:W, :H].T                                                 # back to (H, W)
    loss = jnp.mean(jnp.abs(sil - gt))                                    # F.l1_loss mean
    return loss, sil


# ----------------------------------- main ------------------------------------
if __name__ == "__main__":
    key = jax.random.PRNGKey(0)
    k1, k2, k3 = jax.random.split(key, 3)

    V = 32                 # vertices
    NF = 32                # faces
    H, W = 240, 135        # module raster size: (1920 // 8, 1080 // 8)

    # synthetic hand-ish point cloud in front of the camera
    xy = jax.random.uniform(k1, (V, 2), minval=-1.5, maxval=1.5)
    z = jax.random.uniform(k2, (V, 1), minval=8.0, maxval=12.0)
    verts = jnp.concatenate([xy, z], axis=-1).astype(jnp.float32)

    # deterministic non-degenerate synthetic face connectivity
    idx = jnp.arange(V, dtype=jnp.int32)
    face = jnp.stack([idx, (idx + 5) % V, (idx + 11) % V], axis=-1)[:NF]

    # ground-truth silhouette
    gt = (jax.random.uniform(k3, (H, W)) > 0.5).astype(jnp.float32)

    # fixed rotation from the module's __init__
    R = jnp.array([[-1.0, 0.0, 0.0],
                   [0.0, -1.0, 0.0],
                   [0.0, 0.0, 1.0]], dtype=jnp.float32)

    loss, sil = silhouette_loss(verts, gt, R, face, focal=1000.0, c=512.0)
    jax.block_until_ready((loss, sil))
    assert sil.shape == (H, W) and loss.shape == ()
    assert bool(jnp.isfinite(loss))
    assert bool(jnp.all(jnp.isfinite(sil)))
    print("KERNEL_OK")
</pallas_src>

<mosaic_0001>
module attributes {stable_mosaic.version = 11 : i64} {
  func.func @_raster_kernel(%arg0: i32, %arg1: i32, %arg2: memref<17xi32, #tpu.memory_space<smem>>, %arg3: memref<544xi32, #tpu.memory_space<smem>>, %arg4: memref<528xf32, #tpu.memory_space<smem>>, %arg5: memref<8x256xf32, #tpu.memory_space<vmem>>) attributes {dimension_semantics = [#tpu.dimension_semantics<parallel>, #tpu.dimension_semantics<parallel>], iteration_bounds = array<i64: 17, 1>, scalar_prefetch = 2 : i64, scratch_operands = 0 : i64, tpu.core_type = #tpu.core_type<tc>, window_params = [{transform_indices = @transform_0, window_bounds = array<i64: 528>}, {transform_indices = @transform_1, window_bounds = array<i64: 8, 256>}]} {
    %c1_i32 = arith.constant 1 : i32
    %0 = arith.muli %arg0, %c1_i32 : i32
    %1 = arith.addi %0, %arg1 : i32
    %c8_i32 = arith.constant 8 : i32
    %2 = arith.muli %arg0, %c8_i32 : i32
    %3 = tpu.iota {dimensions = array<i32: 0>} : vector<8x256xi32>
    %4 = vector.broadcast %2 : i32 to vector<8x256xi32>
    %5 = arith.addi %4, %3 : vector<8x256xi32>
    %c256_i32 = arith.constant 256 : i32
    %6 = arith.muli %arg1, %c256_i32 : i32
    %7 = tpu.iota {dimensions = array<i32: 1>} : vector<8x256xi32>
    %8 = vector.broadcast %6 : i32 to vector<8x256xi32>
    %9 = arith.addi %8, %7 : vector<8x256xi32>
    %10 = arith.sitofp %5 : vector<8x256xi32> to vector<8x256xf32>
    %cst = arith.constant 5.000000e-01 : f32
    %11 = vector.broadcast %cst : f32 to vector<8x256xf32>
    %12 = arith.addf %10, %11 : vector<8x256xf32>
    %cst_0 = arith.constant 0.0148148146 : f32
    %13 = vector.broadcast %cst_0 : f32 to vector<8x256xf32>
    %14 = arith.mulf %12, %13 : vector<8x256xf32>
    %cst_1 = arith.constant 1.000000e+00 : f32
    %15 = vector.broadcast %cst_1 : f32 to vector<8x256xf32>
    %16 = arith.subf %14, %15 : vector<8x256xf32>
    %17 = arith.sitofp %9 : vector<8x256xi32> to vector<8x256xf32>
    %cst_2 = arith.constant 5.000000e-01 : f32
    %18 = vector.broadcast %cst_2 : f32 to vector<8x256xf32>
    %19 = arith.addf %17, %18 : vector<8x256xf32>
    %cst_3 = arith.constant 0.00833333377 : f32
    %20 = vector.broadcast %cst_3 : f32 to vector<8x256xf32>
    %21 = arith.mulf %19, %20 : vector<8x256xf32>
    %cst_4 = arith.constant 1.000000e+00 : f32
    %22 = vector.broadcast %cst_4 : f32 to vector<8x256xf32>
    %23 = arith.subf %21, %22 : vector<8x256xf32>
    %24 = arith.index_cast %1 : i32 to index
    %25 = memref.load %arg2[%24] : memref<17xi32, #tpu.memory_space<smem>>
    %c32_i32 = arith.constant 32 : i32
    %26 = arith.muli %1, %c32_i32 : i32
    %cst_5 = arith.constant 1.000000e+00 : f32
    %27 = vector.broadcast %cst_5 : f32 to vector<8x256xf32>
    %c0_i32 = arith.constant 0 : i32
    %28 = arith.subi %25, %c0_i32 : i32
    %29 = arith.addi %c0_i32, %28 : i32
    %c1_i32_6 = arith.constant 1 : i32
    %30 = scf.for %arg6 = %c0_i32 to %29 step %c1_i32_6 iter_args(%arg7 = %27) -> (vector<8x256xf32>)  : i32 {
      %34 = arith.addi %26, %arg6 : i32
      %35 = arith.index_cast %34 : i32 to index
      %36 = memref.load %arg3[%35] : memref<544xi32, #tpu.memory_space<smem>>
      %c16_i32 = arith.constant 16 : i32
      %37 = arith.muli %36, %c16_i32 : i32
      %c0_i32_9 = arith.constant 0 : i32
      %38 = arith.addi %37, %c0_i32_9 : i32
      %c0_i32_10 = arith.constant 0 : i32
      %39 = arith.addi %38, %c0_i32_10 : i32
      %40 = arith.index_cast %39 : i32 to index
      %41 = memref.load %arg4[%40] : memref<528xf32, #tpu.memory_space<smem>>
      %c0_i32_11 = arith.constant 0 : i32
      %42 = arith.addi %37, %c0_i32_11 : i32
      %c1_i32_12 = arith.constant 1 : i32
      %43 = arith.addi %42, %c1_i32_12 : i32
      %44 = arith.index_cast %43 : i32 to index
      %45 = memref.load %arg4[%44] : memref<528xf32, #tpu.memory_space<smem>>
      %c0_i32_13 = arith.constant 0 : i32
      %46 = arith.addi %37, %c0_i32_13 : i32
      %c2_i32 = arith.constant 2 : i32
      %47 = arith.addi %46, %c2_i32 : i32
      %48 = arith.index_cast %47 : i32 to index
      %49 = memref.load %arg4[%48] : memref<528xf32, #tpu.memory_space<smem>>
      %c0_i32_14 = arith.constant 0 : i32
      %50 = arith.addi %37, %c0_i32_14 : i32
      %c3_i32 = arith.constant 3 : i32
      %51 = arith.addi %50, %c3_i32 : i32
      %52 = arith.index_cast %51 : i32 to index
      %53 = memref.load %arg4[%52] : memref<528xf32, #tpu.memory_space<smem>>
      %c0_i32_15 = arith.constant 0 : i32
      %54 = arith.addi %37, %c0_i32_15 : i32
      %c4_i32 = arith.constant 4 : i32
      %55 = arith.addi %54, %c4_i32 : i32
      %56 = arith.index_cast %55 : i32 to index
      %57 = memref.load %arg4[%56] : memref<528xf32, #tpu.memory_space<smem>>
      %58 = vector.broadcast %41 : f32 to vector<8x256xf32>
      %59 = arith.subf %16, %58 : vector<8x256xf32>
      %60 = vector.broadcast %45 : f32 to vector<8x256xf32>
      %61 = arith.subf %23, %60 : vector<8x256xf32>
      %62 = vector.broadcast %49 : f32 to vector<8x256xf32>
      %63 = arith.mulf %59, %62 : vector<8x256xf32>
      %64 = vector.broadcast %53 : f32 to vector<8x256xf32>
      %65 = arith.mulf %61, %64 : vector<8x256xf32>
      %66 = arith.addf %63, %65 : vector<8x256xf32>
      %67 = vector.broadcast %57 : f32 to vector<8x256xf32>
      %68 = arith.mulf %66, %67 : vector<8x256xf32>
      %cst_16 = arith.constant 0.000000e+00 : f32
      %cst_17 = arith.constant 1.000000e+00 : f32
      %69 = vector.broadcast %cst_16 : f32 to vector<8x256xf32>
      %70 = arith.maximumf %69, %68 : vector<8x256xf32>
      %71 = vector.broadcast %cst_17 : f32 to vector<8x256xf32>
      %72 = arith.minimumf %71, %70 : vector<8x256xf32>
      %73 = vector.broadcast %49 : f32 to vector<8x256xf32>
      %74 = arith.mulf %72, %73 : vector<8x256xf32>
      %75 = arith.subf %59, %74 : vector<8x256xf32>
      %76 = vector.broadcast %53 : f32 to vector<8x256xf32>
      %77 = arith.mulf %72, %76 : vector<8x256xf32>
      %78 = arith.subf %61, %77 : vector<8x256xf32>
      %79 = arith.mulf %75, %75 : vector<8x256xf32>
      %80 = arith.mulf %78, %78 : vector<8x256xf32>
      %81 = arith.addf %79, %80 : vector<8x256xf32>
      %82 = vector.broadcast %49 : f32 to vector<8x256xf32>
      %83 = arith.mulf %82, %61 : vector<8x256xf32>
      %84 = vector.broadcast %53 : f32 to vector<8x256xf32>
      %85 = arith.mulf %84, %59 : vector<8x256xf32>
      %86 = arith.subf %83, %85 : vector<8x256xf32>
      %c5_i32 = arith.constant 5 : i32
      %87 = arith.addi %37, %c5_i32 : i32
      %c0_i32_18 = arith.constant 0 : i32
      %88 = arith.addi %87, %c0_i32_18 : i32
      %89 = arith.index_cast %88 : i32 to index
      %90 = memref.load %arg4[%89] : memref<528xf32, #tpu.memory_space<smem>>
      %c5_i32_19 = arith.constant 5 : i32
      %91 = arith.addi %37, %c5_i32_19 : i32
      %c1_i32_20 = arith.constant 1 : i32
      %92 = arith.addi %91, %c1_i32_20 : i32
      %93 = arith.index_cast %92 : i32 to index
      %94 = memref.load %arg4[%93] : memref<528xf32, #tpu.memory_space<smem>>
      %c5_i32_21 = arith.constant 5 : i32
      %95 = arith.addi %37, %c5_i32_21 : i32
      %c2_i32_22 = arith.constant 2 : i32
      %96 = arith.addi %95, %c2_i32_22 : i32
      %97 = arith.index_cast %96 : i32 to index
      %98 = memref.load %arg4[%97] : memref<528xf32, #tpu.memory_space<smem>>
      %c5_i32_23 = arith.constant 5 : i32
      %99 = arith.addi %37, %c5_i32_23 : i32
      %c3_i32_24 = arith.constant 3 : i32
      %100 = arith.addi %99, %c3_i32_24 : i32
      %101 = arith.index_cast %100 : i32 to index
      %102 = memref.load %arg4[%101] : memref<528xf32, #tpu.memory_space<smem>>
      %c5_i32_25 = arith.constant 5 : i32
      %103 = arith.addi %37, %c5_i32_25 : i32
      %c4_i32_26 = arith.constant 4 : i32
      %104 = arith.addi %103, %c4_i32_26 : i32
      %105 = arith.index_cast %104 : i32 to index
      %106 = memref.load %arg4[%105] : memref<528xf32, #tpu.memory_space<smem>>
      %107 = vector.broadcast %90 : f32 to vector<8x256xf32>
      %108 = arith.subf %16, %107 : vector<8x256xf32>
      %109 = vector.broadcast %94 : f32 to vector<8x256xf32>
      %110 = arith.subf %23, %109 : vector<8x256xf32>
      %111 = vector.broadcast %98 : f32 to vector<8x256xf32>
      %112 = arith.mulf %108, %111 : vector<8x256xf32>
      %113 = vector.broadcast %102 : f32 to vector<8x256xf32>
      %114 = arith.mulf %110, %113 : vector<8x256xf32>
      %115 = arith.addf %112, %114 : vector<8x256xf32>
      %116 = vector.broadcast %106 : f32 to vector<8x256xf32>
      %117 = arith.mulf %115, %116 : vector<8x256xf32>
      %cst_27 = arith.constant 0.000000e+00 : f32
      %cst_28 = arith.constant 1.000000e+00 : f32
      %118 = vector.broadcast %cst_27 : f32 to vector<8x256xf32>
      %119 = arith.maximumf %118, %117 : vector<8x256xf32>
      %120 = vector.broadcast %cst_28 : f32 to vector<8x256xf32>
      %121 = arith.minimumf %120, %119 : vector<8x256xf32>
      %122 = vector.broadcast %98 : f32 to vector<8x256xf32>
      %123 = arith.mulf %121, %122 : vector<8x256xf32>
      %124 = arith.subf %108, %123 : vector<8x256xf32>
      %125 = vector.broadcast %102 : f32 to vector<8x256xf32>
      %126 = arith.mulf %121, %125 : vector<8x256xf32>
      %127 = arith.subf %110, %126 : vector<8x256xf32>
      %128 = arith.mulf %124, %124 : vector<8x256xf32>
      %129 = arith.mulf %127, %127 : vector<8x256xf32>
      %130 = arith.addf %128, %129 : vector<8x256xf32>
      %131 = vector.broadcast %98 : f32 to vector<8x256xf32>
      %132 = arith.mulf %131, %110 : vector<8x256xf32>
      %133 = vector.broadcast %102 : f32 to vector<8x256xf32>
      %134 = arith.mulf %133, %108 : vector<8x256xf32>
      %135 = arith.subf %132, %134 : vector<8x256xf32>
      %c10_i32 = arith.constant 10 : i32
      %136 = arith.addi %37, %c10_i32 : i32
      %c0_i32_29 = arith.constant 0 : i32
      %137 = arith.addi %136, %c0_i32_29 : i32
      %138 = arith.index_cast %137 : i32 to index
      %139 = memref.load %arg4[%138] : memref<528xf32, #tpu.memory_space<smem>>
      %c10_i32_30 = arith.constant 10 : i32
      %140 = arith.addi %37, %c10_i32_30 : i32
      %c1_i32_31 = arith.constant 1 : i32
      %141 = arith.addi %140, %c1_i32_31 : i32
      %142 = arith.index_cast %141 : i32 to index
      %143 = memref.load %arg4[%142] : memref<528xf32, #tpu.memory_space<smem>>
      %c10_i32_32 = arith.constant 10 : i32
      %144 = arith.addi %37, %c10_i32_32 : i32
      %c2_i32_33 = arith.constant 2 : i32
      %145 = arith.addi %144, %c2_i32_33 : i32
      %146 = arith.index_cast %145 : i32 to index
      %147 = memref.load %arg4[%146] : memref<528xf32, #tpu.memory_space<smem>>
      %c10_i32_34 = arith.constant 10 : i32
      %148 = arith.addi %37, %c10_i32_34 : i32
      %c3_i32_35 = arith.constant 3 : i32
      %149 = arith.addi %148, %c3_i32_35 : i32
      %150 = arith.index_cast %149 : i32 to index
      %151 = memref.load %arg4[%150] : memref<528xf32, #tpu.memory_space<smem>>
      %c10_i32_36 = arith.constant 10 : i32
      %152 = arith.addi %37, %c10_i32_36 : i32
      %c4_i32_37 = arith.constant 4 : i32
      %153 = arith.addi %152, %c4_i32_37 : i32
      %154 = arith.index_cast %153 : i32 to index
      %155 = memref.load %arg4[%154] : memref<528xf32, #tpu.memory_space<smem>>
      %156 = vector.broadcast %139 : f32 to vector<8x256xf32>
      %157 = arith.subf %16, %156 : vector<8x256xf32>
      %158 = vector.broadcast %143 : f32 to vector<8x256xf32>
      %159 = arith.subf %23, %158 : vector<8x256xf32>
      %160 = vector.broadcast %147 : f32 to vector<8x256xf32>
      %161 = arith.mulf %157, %160 : vector<8x256xf32>
      %162 = vector.broadcast %151 : f32 to vector<8x256xf32>
      %163 = arith.mulf %159, %162 : vector<8x256xf32>
      %164 = arith.addf %161, %163 : vector<8x256xf32>
      %165 = vector.broadcast %155 : f32 to vector<8x256xf32>
      %166 = arith.mulf %164, %165 : vector<8x256xf32>
      %cst_38 = arith.constant 0.000000e+00 : f32
      %cst_39 = arith.constant 1.000000e+00 : f32
      %167 = vector.broadcast %cst_38 : f32 to vector<8x256xf32>
      %168 = arith.maximumf %167, %166 : vector<8x256xf32>
      %169 = vector.broadcast %cst_39 : f32 to vector<8x256xf32>
      %170 = arith.minimumf %169, %168 : vector<8x256xf32>
      %171 = vector.broadcast %147 : f32 to vector<8x256xf32>
      %172 = arith.mulf %170, %171 : vector<8x256xf32>
      %173 = arith.subf %157, %172 : vector<8x256xf32>
      %174 = vector.broadcast %151 : f32 to vector<8x256xf32>
      %175 = arith.mulf %170, %174 : vector<8x256xf32>
      %176 = arith.subf %159, %175 : vector<8x256xf32>
      %177 = arith.mulf %173, %173 : vector<8x256xf32>
      %178 = arith.mulf %176, %176 : vector<8x256xf32>
      %179 = arith.addf %177, %178 : vector<8x256xf32>
      %180 = vector.broadcast %147 : f32 to vector<8x256xf32>
      %181 = arith.mulf %180, %159 : vector<8x256xf32>
      %182 = vector.broadcast %151 : f32 to vector<8x256xf32>
      %183 = arith.mulf %182, %157 : vector<8x256xf32>
      %184 = arith.subf %181, %183 : vector<8x256xf32>
      %185 = arith.minimumf %81, %130 : vector<8x256xf32>
      %186 = arith.minimumf %185, %179 : vector<8x256xf32>
      %187 = arith.minimumf %86, %135 : vector<8x256xf32>
      %188 = arith.minimumf %187, %184 : vector<8x256xf32>
      %cst_40 = arith.constant 0.000000e+00 : f32
      %189 = vector.broadcast %cst_40 : f32 to vector<8x256xf32>
      %190 = arith.cmpf oge, %188, %189 : vector<8x256xf32>
      %191 = arith.maximumf %86, %135 : vector<8x256xf32>
      %192 = arith.maximumf %191, %184 : vector<8x256xf32>
      %cst_41 = arith.constant 0.000000e+00 : f32
      %193 = vector.broadcast %cst_41 : f32 to vector<8x256xf32>
      %194 = arith.cmpf ole, %192, %193 : vector<8x256xf32>
      %195 = arith.ori %190, %194 : vector<8x256xi1>
      %cst_42 = arith.constant 0.000000e+00 : f32
      %196 = vector.broadcast %cst_42 : f32 to vector<8x256xf32>
      %197 = arith.subf %196, %186 : vector<8x256xf32>
      %198 = arith.select %195, %197, %186 : vector<8x256xi1>, vector<8x256xf32>
      %cst_43 = arith.constant -1.000000e+04 : f32
      %199 = vector.broadcast %cst_43 : f32 to vector<8x256xf32>
      %200 = arith.mulf %198, %199 : vector<8x256xf32>
      %cst_44 = arith.constant 3.000000e+01 : f32
      %201 = vector.broadcast %cst_44 : f32 to vector<8x256xf32>
      %202 = arith.minimumf %200, %201 : vector<8x256xf32>
      %203 = math.exp %202 : vector<8x256xf32>
      %cst_45 = arith.constant 1.000000e+00 : f32
      %204 = vector.broadcast %cst_45 : f32 to vector<8x256xf32>
      %205 = arith.addf %204, %203 : vector<8x256xf32>
      %206 = tpu.reciprocal %205 {approx = true} : vector<8x256xf32> -> vector<8x256xf32>
      %cst_46 = arith.constant 9.210240e-04 : f32
      %207 = vector.broadcast %cst_46 : f32 to vector<8x256xf32>
      %208 = arith.cmpf ole, %198, %207 : vector<8x256xf32>
      %cst_47 = arith.constant 1.000000e+00 : f32
      %209 = vector.broadcast %cst_47 : f32 to vector<8x256xf32>
      %210 = arith.select %208, %206, %209 : vector<8x256xi1>, vector<8x256xf32>
      %211 = arith.mulf %arg7, %210 : vector<8x256xf32>
      scf.yield %211 : vector<8x256xf32>
    }
    %cst_7 = arith.constant 1.000000e+00 : f32
    %31 = vector.broadcast %cst_7 : f32 to vector<8x256xf32>
    %32 = arith.subf %31, %30 : vector<8x256xf32>
    %c0 = arith.constant 0 : index
    %c0_8 = arith.constant 0 : index
    %33 = vector.load %arg5[%c0, %c0_8] : memref<8x256xf32, #tpu.memory_space<vmem>>, vector<8x256xf32>
    tpu.vector_store %arg5[%c0, %c0_8], %32 {strides = array<i32>} : memref<8x256xf32, #tpu.memory_space<vmem>>, vector<8x256xf32>,
    return
  }
  func.func @transform_0(%arg0: i32, %arg1: i32, %arg2: memref<17xi32, #tpu.memory_space<smem>>, %arg3: memref<544xi32, #tpu.memory_space<smem>>) -> i32 {
    %c0_i32 = arith.constant 0 : i32
    %c0_i32_0 = arith.constant 0 : i32
    return %c0_i32 : i32
  }
  func.func @transform_1(%arg0: i32, %arg1: i32, %arg2: memref<17xi32, #tpu.memory_space<smem>>, %arg3: memref<544xi32, #tpu.memory_space<smem>>) -> (i32, i32) {
    %c0_i32 = arith.constant 0 : i32
    return %arg0, %arg1 : i32, i32
  }
}

</mosaic_0001>

<bundles_post_ra>
// kernel: tpu_custom_call.1
= control target key start
LH: loop header
LB: loop body
LE: loop exit
PB: predicated region body
PF: predicated region fallthrough
CT: control target
= control target key end

     0   :  { %s740_s12 = smov [#allocation3]   ;;  %s741_s15 = smov [#allocation4]   ;;  %s1005_s0 = inlined_call_operand.hbm [shape: s32[17], index: 0, kind: input, shape index: {}]   ;;  %s1006_s2 = inlined_call_operand.hbm [shape: f32[528], index: 2, kind: input, shape index: {}]   ;;  %s1007_s3 = inlined_call_operand.hbm [shape: f32[136,256], index: 3, kind: output, shape index: {}]   ;;  %s1008_s1 = inlined_call_operand.hbm [shape: s32[544], index: 1, kind: input, shape index: {}]  }
   0x1   :  { %9 = dma.hbm_to_smem %s1005_s0, 16, %s740_s12, [#allocation2] }
   0x2   :  { %11 = dma.hbm_to_smem %s1008_s1, 80, %s741_s15, [#allocation2] }
   0x3   :  { %686 = dma.done.wait [#allocation2], 96 }
   0x4   :  { %687 = vsyncadd [#allocation2], 4294967200 }
   0x5   :  { %13 = sfence }
   0x6   :  { %14 = vsyncpa [#allocation7], 0 }
   0x7   :  { %15 = vsyncpa [#allocation6], 0 }
   0x8   :  { %17 = vsyncpa [#allocation6 + $0x1], 0  ;;  %s770_s18 = smov 0   ;;  %s772_s19 = smov 0  }
   0x9   :  { %s774_s20 = smov 0   ;;  %s776_s21 = smov 0  }
   0xa   :  { %s778_s0 = smov 0   ;;  %s780_s22 = smov 0  }
   0xb LB: > { %s453_s1 = sadd.s32 4294967295, %s718_s22   ;;  %s454_s23 = sadd.s32 4294967294, %s718_s22   ;;  %s718_s22 = sphi %s780_s22, %s23_s22   ;;  %s714_s0 = sphi %s778_s0, %s1020_s0   ;;  %s710_s21 = sphi %s776_s21, %s1019_s21   ;;  %s706_s20 = sphi %s774_s20, %s1018_s20   ;;  %s702_s19 = sphi %s772_s19, %s1017_s19   ;;  %s698_s18 = sphi %s770_s18, %s1016_s18  }
   0xc   : > { %s35_s24 = sadd.s32 1, %s714_s0  ;;  %s65_s25 = sadd.s32 1, %s706_s20 }
   0xd   : > { %p37_p0 = scmp.ge.s32.totalorder %s35_s24, 17  ;;  %p75_p1 = scmp.ne.s32.totalorder %s706_s20, %s702_s19 }
   0xe   : > { %p76_p2 = scmp.eq.s32.totalorder %s453_s1, 16  ;;  %p81_p3 = scmp.ne.s32.totalorder %s702_s19, %s698_s18 }
   0xf   : > { %s1022_s24 = smov (%p37_p0, %s35_s24), 0  ;;  %p82_p5 = scmp.eq.s32.totalorder %s454_s23, 16 }
  0x10   : > { %p810_p4 = por %p76_p2, %p75_p1  ;;  %s60_s27 = ssub.s32 %s714_s0, %s1022_s24 }
  0x11   : > { %p455_p6 = scmp.ge.s32.totalorder %s718_s22, 1  ;;  %p63_p7 = scmp.eq.s32.totalorder %s60_s27, 0 }
  0x12   : > { %p817_p8 = por %p82_p5, %p81_p3  ;;  %p89_p9 = scmp.lt.s32.totalorder %s718_s22, 18 }
  0x13   : > { %s823_s29 = scalar_select %p63_p7, %s706_s20, %s65_s25  }
  0x14   : > { %p90_p10 = pnand %p455_p6, %p89_p9  ;;  %p487_p11 = scmp.eq.s32.totalorder %s453_s1, 0 }
  0x15   : > { %s742_s30 = smov [#allocation5]  }
  0x16   : > { %p479_p12 = pneg %p90_p10  ;;  %113 = sbr.rel (%p90_p10) target bundleno = 166 (0xa6), region = 24 }
  0x18   : > { %p480_p13 = pnand %p487_p11, %p479_p12 }
  0x1a   : > { %482 = dma.hbm_to_smem (!%p480_p13), %s1006_s2, 80, %s742_s30, [#allocation7]  }
  0x1b   : > { %689 = dma.done.wait (%p487_p11), [#allocation7], 80  }
  0x1c   : > { %691 = vsyncadd (%p487_p11), [#allocation7], 4294967216 }
  0x1d   : > { %119 = sfence }
  0x1e   : > { %s126_s6 = sand.u32 1, %s702_s19   ;;  %s460_s7 = sshll.u32 %s710_s21, 3  ;;  %v132_v0 = vlaneseq  ;;  %v845_v18 = vmov 1.0   ;;  %v847_v19 = vmov 1.0  }
  0x1f   : > { %s459_s8 = sshll.u32 %s126_s6, 4  ;;  %v134_v1 = vstv %s460_s7  ;;  %s833_s9 = sld [smem:[#allocation3 + %s710_s21]] }
  0x20   : > { %v133_v2 = vshrl.u32 %v132_v0, 7  ;;  %v138_v3 = vand.u32 127, %v132_v0  ;;  %s842_s11 = scalar_lea.vmem [#allocation8], %s459_s8 }
  0x22   : > { %v135_v4 = vadd.s32 %v134_v1, %v133_v2  ;;  %v139_v5 = vadd.s32 128, %v138_v3  ;;  %v147_v6 = vcvt.s32.f32 %v138_v3 }
  0x24   : > { %v143_v7 = vcvt.s32.f32 %v135_v4  ;;  %v148_v8 = vcvt.s32.f32 %v139_v5  ;;  %v149_v9 = vadd.f32 0.5, %v147_v6 }
  0x25   : > { %p465_p0 = scmp.le.s32.totalorder %s833_s9, 0 }
  0x26   : > { %v144_v10 = vadd.f32 0.5, %v143_v7  ;;  %v150_v11 = vadd.f32 0.5, %v148_v8  ;;  %v151_v12 = vmul.f32 0.008333334, %v149_v9  ;;  %s853_s12 = smov (!%p465_p0), 0  }
  0x27   : > { %414 = sbr.rel (%p465_p0) target bundleno = 143 (0x8f), region = 62 }
  0x28   : > { %v145_v13 = vmul.f32 0.014814815, %v144_v10  ;;  %v152_v14 = vmul.f32 0.008333334, %v150_v11  ;;  %v836_v15 = vadd.f32 -1.0, %v151_v12 }
  0x2a   : > { %v838_v16 = vadd.f32 -1.0, %v145_v13  ;;  %v840_v17 = vadd.f32 -1.0, %v152_v14 }
  0x2c   : > { %v849_v20 = vmov 1.0   ;;  %v851_v21 = vmov 1.0  }
  0x2d LB: >> { %s1011_s10 = sshll.u32 %s710_s21, 5  ;;  %s730_s12 = sphi %s853_s12, %s160_s12   ;;  %v726_v21 = vphi %v851_v21, %v1013_v21   ;;  %v722_v20 = vphi %v849_v20, %v1012_v20  }
  0x2e   : >> { %s165_s13 = sadd.s32 %s730_s12, %s1011_s10  ;;  %s160_s12 = sadd.s32 1, %s730_s12  }
  0x2f   : >> { %s166_s14 = sld [smem:[#allocation4 + %s165_s13]]  ;;  %p159_p1 = scmp.ge.s32.totalorder %s160_s12, %s833_s9 }
  0x35   : >> { %s867_s15 = sshll.u32 %s166_s14, 4 }
  0x36   : >> { %s168_s16 = sld [smem:[#allocation5 + %s867_s15]]  ;;  %s169_s17 = sadd.s32 1, %s867_s15 }
  0x37   : >> { %s170_s1 = sld [smem:[#allocation5 + %s169_s17]]  ;;  %s171_s23 = sadd.s32 2, %s867_s15 }
  0x38   : >> { %s172_s25 = sld [smem:[#allocation5 + %s171_s23]]  ;;  %s173_s27 = sadd.s32 3, %s867_s15 }
  0x39   : >> { %s174_s30 = sld [smem:[#allocation5 + %s173_s27]]  ;;  %s175_s4 = sadd.s32 4, %s867_s15 }
  0x3a   : >> { %s874_s5 = sld [smem:[#allocation5 + %s175_s4]]  ;;  %s215_s7 = sadd.s32 5, %s867_s15 }
  0x3b   : >> { %s216_s8 = sld [smem:[#allocation5 + %s215_s7]]  ;;  %s217_s13 = sadd.s32 6, %s867_s15 }
  0x3c   : >> { %v177_v22 = vstv %s168_s16  ;;  %s218_s14 = sld [smem:[#allocation5 + %s217_s13]]  ;;  %s219_s10 = sadd.s32 7, %s867_s15 }
  0x3d   : >> { %v880_v23 = vsub.f32 %v838_v16, %v177_v22  ;;  %v179_v24 = vstv %s170_s1  ;;  %s220_s17 = sld [smem:[#allocation5 + %s219_s10]]  ;;  %s221_s23 = sadd.s32 8, %s867_s15 }
  0x3e   : >> { %v884_v25 = vsub.f32 %v836_v15, %v179_v24  ;;  %v887_v26 = vsub.f32 %v840_v17, %v179_v24  ;;  %v182_v27 = vstv %s172_s25  ;;  %s222_s27 = sld [smem:[#allocation5 + %s221_s23]]  ;;  %s223_s16 = sadd.s32 9, %s867_s15 }
  0x3f   : >> { %v183_v28 = vmul.f32 %v182_v27, %v880_v23  ;;  %v184_v29 = vstv %s174_s30  ;;  %s891_s4 = sld [smem:[#allocation5 + %s223_s16]]  ;;  %s263_s1 = sadd.s32 10, %s867_s15 }
  0x40   : >> { %v185_v30 = vmul.f32 %v184_v29, %v884_v25  ;;  %v186_v31 = vmul.f32 %v184_v29, %v887_v26  ;;  %s896_s10 = sld [smem:[#allocation5 + %s263_s1]]  ;;  %s265_s7 = sadd.s32 11, %s867_s15  ;;  %v189_v32 = vstv %s874_s5  ;;  %v210_v44 = vmul.f32 %v182_v27, %v884_v25 }
  0x41   : >> { %v225_v33 = vstv %s216_s8  ;;  %s900_s13 = sld [smem:[#allocation5 + %s265_s7]]  ;;  %s267_s25 = sadd.s32 12, %s867_s15  ;;  %v212_v50 = vmul.f32 %v184_v29, %v880_v23  ;;  %v211_v61 = vmul.f32 %v182_v27, %v887_v26 }
  0x42   : >> { %v187_v34 = vadd.f32 %v185_v30, %v183_v28  ;;  %v188_v35 = vadd.f32 %v186_v31, %v183_v28  ;;  %v226_v36 = vsub.f32 %v838_v16, %v225_v33  ;;  %v227_v37 = vstv %s218_s14  ;;  %s269_s30 = sadd.s32 13, %s867_s15  ;;  %s907_s5 = sld [smem:[#allocation5 + %s267_s25]] }
  0x43   : >> { %v228_v38 = vsub.f32 %v836_v15, %v227_v37  ;;  %v229_v39 = vsub.f32 %v840_v17, %v227_v37  ;;  %v230_v42 = vstv %s220_s17  ;;  %s910_s8 = sld [smem:[#allocation5 + %s269_s30]]  ;;  %s271_s14 = sadd.s32 14, %s867_s15  ;;  %v918_v62 = vsub.f32 %v210_v44, %v212_v50 }
  0x44   : >> { %v190_v40 = vmul.f32 %v189_v32, %v187_v34  ;;  %v191_v41 = vmul.f32 %v189_v32, %v188_v35  ;;  %v232_v43 = vstv %s222_s27  ;;  %v231_v45 = vmul.f32 %v230_v42, %v226_v36  ;;  %s920_s17 = sld [smem:[#allocation5 + %s271_s14]] }
  0x45   : >> { %v233_v46 = vmul.f32 %v232_v43, %v228_v38  ;;  %v234_v47 = vmul.f32 %v232_v43, %v229_v39  ;;  %v237_v51 = vstv %s891_s4  ;;  %v258_v63 = vmul.f32 %v230_v42, %v228_v38 }
  0x46   : >> { %v192_v48 = vmax.f32 %v190_v40, 0.0  ;;  %v193_v49 = vmax.f32 %v191_v41, 0.0  ;;  %v273_v56 = vstv %s896_s10  ;;  %v260_v2 = vmul.f32 %v232_v43, %v226_v36 }
  0x47   : >> { %v235_v52 = vadd.f32 %v233_v46, %v231_v45  ;;  %v236_v53 = vadd.f32 %v234_v47, %v231_v45  ;;  %v275_v59 = vstv %s900_s13  ;;  %v923_v3 = vsub.f32 %v838_v16, %v273_v56 }
  0x48   : >> { %v194_v54 = vmin.f32 %v192_v48, 1.0  ;;  %v195_v55 = vmin.f32 %v193_v49, 1.0  ;;  %v276_v7 = vsub.f32 %v836_v15, %v275_v59  ;;  %v278_v10 = vstv %s907_s5 }
  0x49   : >> { %v238_v57 = vmul.f32 %v237_v51, %v235_v52  ;;  %v239_v58 = vmul.f32 %v237_v51, %v236_v53  ;;  %v280_v11 = vstv %s910_s8  ;;  %v214_v13 = vsub.f32 %v211_v61, %v212_v50 }
  0x4a   : >> { %v196_v60 = vmul.f32 %v194_v54, %v182_v27  ;;  %v197_v4 = vmul.f32 %v195_v55, %v182_v27  ;;  %v200_v5 = vmul.f32 %v194_v54, %v184_v29  ;;  %v201_v6 = vmul.f32 %v195_v55, %v184_v29 }
  0x4b   : >> { %v240_v0 = vmax.f32 %v238_v57, 0.0  ;;  %v241_v1 = vmax.f32 %v239_v58, 0.0  ;;  %v259_v14 = vmul.f32 %v230_v42, %v229_v39  ;;  %v277_v18 = vsub.f32 %v840_v17, %v275_v59 }
  0x4c   : >> { %v198_v12 = vsub.f32 %v880_v23, %v196_v60  ;;  %v202_v27 = vsub.f32 %v884_v25, %v200_v5  ;;  %v261_v29 = vsub.f32 %v258_v63, %v260_v2  ;;  %v279_v30 = vmul.f32 %v278_v10, %v923_v3 }
  0x4d   : >> { %v242_v8 = vmin.f32 %v240_v0, 1.0  ;;  %v243_v9 = vmin.f32 %v241_v1, 1.0  ;;  %v281_v31 = vmul.f32 %v280_v11, %v276_v7  ;;  %v199_v32 = vsub.f32 %v880_v23, %v197_v4 }
  0x4e   : >> { %v203_v33 = vsub.f32 %v887_v26, %v201_v6  ;;  %v282_v40 = vmul.f32 %v280_v11, %v277_v18  ;;  %v285_v44 = vstv %s920_s17  ;;  %v204_v45 = vmul.f32 %v198_v12, %v198_v12 }
  0x4f   : >> { %v244_v19 = vmul.f32 %v242_v8, %v230_v42  ;;  %v245_v22 = vmul.f32 %v243_v9, %v230_v42  ;;  %v248_v24 = vmul.f32 %v242_v8, %v232_v43  ;;  %v249_v28 = vmul.f32 %v243_v9, %v232_v43 }
  0x50   : >> { %v283_v41 = vadd.f32 %v281_v31, %v279_v30  ;;  %v262_v46 = vsub.f32 %v259_v14, %v260_v2  ;;  %v306_v43 = vmul.f32 %v278_v10, %v276_v7  ;;  %v206_v47 = vmul.f32 %v202_v27, %v202_v27 }
  0x51   : >> { %v246_v34 = vsub.f32 %v226_v36, %v244_v19  ;;  %v250_v35 = vsub.f32 %v228_v38, %v248_v24  ;;  %v247_v37 = vsub.f32 %v226_v36, %v245_v22  ;;  %v251_v42 = vsub.f32 %v229_v39, %v249_v28 }
  0x52   : >> { %v284_v25 = vadd.f32 %v282_v40, %v279_v30  ;;  %v286_v48 = vmul.f32 %v285_v44, %v283_v41  ;;  %v308_v49 = vmul.f32 %v280_v11, %v923_v3  ;;  %v205_v50 = vmul.f32 %v199_v32, %v199_v32 }
  0x53   : >> { %v252_v51 = vmul.f32 %v246_v34, %v246_v34  ;;  %v254_v23 = vmul.f32 %v250_v35, %v250_v35  ;;  %v307_v52 = vmul.f32 %v278_v10, %v277_v18  ;;  %v207_v26 = vmul.f32 %v203_v33, %v203_v33 }
  0x54   : >> { %v253_v53 = vmul.f32 %v247_v37, %v247_v37  ;;  %v287_v38 = vmul.f32 %v285_v44, %v284_v25  ;;  %v288_v36 = vmax.f32 %v286_v48, 0.0  ;;  %v255_v54 = vmul.f32 %v251_v42, %v251_v42 }
  0x55   : >> { %v309_v55 = vsub.f32 %v306_v43, %v308_v49  ;;  %v315_v56 = vmin.f32 %v918_v62, %v261_v29  ;;  %v321_v39 = vmax.f32 %v918_v62, %v261_v29  ;;  %v208_v57 = vadd.f32 %v206_v47, %v204_v45 }
  0x56   : >> { %v289_v58 = vmax.f32 %v287_v38, 0.0  ;;  %v290_v59 = vmin.f32 %v288_v36, 1.0  ;;  %v256_v60 = vadd.f32 %v254_v23, %v252_v51  ;;  %v310_v61 = vsub.f32 %v307_v52, %v308_v49 }
  0x57   : >> { %v316_v63 = vmin.f32 %v214_v13, %v262_v46  ;;  %v322_v0 = vmax.f32 %v214_v13, %v262_v46  ;;  %v209_v5 = vadd.f32 %v207_v26, %v205_v50  ;;  %v257_v6 = vadd.f32 %v255_v54, %v253_v53 }
  0x58   : >> { %v291_v1 = vmin.f32 %v289_v58, 1.0  ;;  %v292_v2 = vmul.f32 %v290_v59, %v278_v10  ;;  %v296_v4 = vmul.f32 %v290_v59, %v280_v11  ;;  %v317_v8 = vmin.f32 %v315_v56, %v309_v55 }
  0x59   : >> { %v323_v9 = vmax.f32 %v321_v39, %v309_v55  ;;  %v311_v62 = vmin.f32 %v208_v57, %v256_v60  ;;  %v318_v24 = vmin.f32 %v316_v63, %v310_v61  ;;  %v324_v28 = vmax.f32 %v322_v0, %v310_v61 }
  0x5a   : >> { %v293_v12 = vmul.f32 %v291_v1, %v278_v10  ;;  %v294_v14 = vsub.f32 %v923_v3, %v292_v2  ;;  %v297_v19 = vmul.f32 %v291_v1, %v280_v11  ;;  %v298_v22 = vsub.f32 %v276_v7, %v296_v4 }
  0x5b   : >> { %v312_v31 = vmin.f32 %v209_v5, %v257_v6  ;;  %vm319_vm0 = vcmp.ge.f32.partialorder %v317_v8, 0.0  ;;  %vm325_vm1 = vcmp.le.f32.partialorder %v323_v9, 0.0  ;;  %vm320_vm2 = vcmp.ge.f32.partialorder %v318_v24, 0.0 }
  0x5c   : >> { %v295_v27 = vsub.f32 %v923_v3, %v293_v12  ;;  %v299_v29 = vsub.f32 %v277_v18, %v297_v19  ;;  %v300_v30 = vmul.f32 %v294_v14, %v294_v14  ;;  %v302_v13 = vmul.f32 %v298_v22, %v298_v22  ;;  %vm327_vm4 = vmor %vm319_vm0, %vm325_vm1 }
  0x5d   : >> { %vm326_vm3 = vcmp.le.f32.partialorder %v324_v28, 0.0 }
  0x5e   : >> { %v301_v32 = vmul.f32 %v295_v27, %v295_v27  ;;  %v303_v33 = vmul.f32 %v299_v29, %v299_v29  ;;  %v304_v34 = vadd.f32 %v302_v13, %v300_v30  ;;  %vm328_vm5 = vmor %vm320_vm2, %vm326_vm3 }
  0x60   : >> { %v305_v35 = vadd.f32 %v303_v33, %v301_v32  ;;  %v313_v10 = vmin.f32 %v311_v62, %v304_v34 }
  0x62   : >> { %v314_v7 = vmin.f32 %v312_v31, %v305_v35  ;;  %v329_v11 = vsub.f32 0.0, %v313_v10 }
  0x64   : >> { %v330_v37 = vsub.f32 0.0, %v314_v7  ;;  %v331_v40 = vsel %vm327_vm4, %v329_v11, %v313_v10 }
  0x65   : >> { %v333_v3 = vmul.f32 -10000.0, %v331_v40  ;;  %vm345_vm6 = vcmp.le.f32.partialorder %v331_v40, 0.000921024 }
  0x66   : >> { %v332_v18 = vsel %vm328_vm5, %v330_v37, %v314_v7 }
  0x67   : >> { %v334_v41 = vmul.f32 -10000.0, %v332_v18  ;;  %v335_v44 = vmin.f32 %v333_v3, 30.0  ;;  %vm346_vm7 = vcmp.le.f32.partialorder %v332_v18, 0.000921024 }
  0x69   : >> { %v336_v45 = vmin.f32 %v334_v41, 30.0  ;;  %v337_v42 = vmul.f32 1.442695, %v335_v44 }
  0x6b   : >> { %581 = vpow2.f32 %v337_v42  ;;  %v339_v46 = vmul.f32 1.442695, %v336_v45 }
  0x6d   : >> { %583 = vpow2.f32 %v339_v46 }
  0x78   : >> { %v582_v43 = vpop.eup %581 }
  0x79   : >> { %v341_v47 = vadd.f32 1.0, %v582_v43 }
  0x7a   : >> { %v584_v25 = vpop.eup %583 }
  0x7b   : >> { %v342_v48 = vadd.f32 1.0, %v584_v25  ;;  %585 = vrcp.f32 %v341_v47 }
  0x7d   : >> { %587 = vrcp.f32 %v342_v48 }
  0x88   : >> { %v586_v49 = vpop.eup %585 }
  0x89   : >> { %v347_v50 = vsel %vm345_vm6, %v586_v49, 1.0 }
  0x8a   : >> { %v588_v51 = vpop.eup %587  ;;  %v349_v23 = vmul.f32 %v726_v21, %v347_v50   ;;  %162 = sbr.rel (!%p159_p1) target bundleno = 45 (0x2d), region = 68 }
  0x8b   : >> { %v348_v52 = vsel %vm346_vm7, %v588_v51, 1.0 }
  0x8c   : >> { %v350_v26 = vmul.f32 %v722_v20, %v348_v52   ;;  %v1013_v21 = vmov %v349_v23  ;;  %v1015_v19 = vmov (%p159_p1), %v349_v23 }
  0x8e   : >> { %v1012_v20 = vmov %v350_v26  ;;  %v1014_v18 = vmov (%p159_p1), %v350_v26 }
  0x8f PF: > { %v351_v21 = vsub.f32 1.0, %v738_v19  ;;  %v352_v53 = vsub.f32 1.0, %v734_v18  ;;  %s472_s12 = sshll.u32 %s710_s21, 8  ;;  %s372_s27 = sshll.u32 %s842_s11, 4  ;;  %v738_v19 = vphi %v847_v19, %v1015_v19   ;;  %v734_v18 = vphi %v845_v18, %v1014_v18   ;;  %s373_s27 = int_to_ptr.vmem [resolvable:$true] %s372_s27 }
  0x90   : > { %s960_s23 = scalar_lea.hbm %s1007_s3, %s472_s12  ;;  %s356_s16 = scalar_lea.sflag [#allocation6], %s126_s6 }
  0x91   : > { %353 = vst [vmem:[%s842_s11] sm:$0xff] %v351_v21  ;;  %354 = vst [vmem:[%s842_s11 + $0x8] sm:$0xff] %v352_v53  ;;  %s616_s4 = scalar_lea.vmem %s373_s27, 256  ;;  %s743_s1 = smov [#allocation8]  }
  0x92   : > { %p617_p2 = scmp.ne.s32.totalorder %s373_s27, %s616_s4  ;;  %s620_s10 = sshll.u32 %s743_s1, 4  ;;  %s621_s10 = int_to_ptr.vmem [resolvable:$false] %s620_s10 }
  0x93   : > { %s622_s21 = scalar_lea.vmem %s621_s10, 512  ;;  %p623_p6 = scmp.lt.s32.totalorder %s373_s27, %s621_s10 }
  0x94   : > { %p618_p3 = pnand %p617_p2, %p810_p4  ;;  %p624_p7 = scmp.lt.s32.totalorder %s622_s21, %s616_s4 }
  0x96   : > { %p619_p5 = pneg %p618_p3  ;;  %p625_p9 = por %p624_p7, %p623_p6 }
  0x98   : > { %p626_p10 = pnand %p625_p9, %p619_p5 }
  0x9a   : > { %629 = shalt.err (!%p626_p10)
}
  0x9b   : > { %s630_s11 = scalar_lea.hbm %s960_s23, 256  ;;  %s634_s13 = scalar_lea.hbm %s1007_s3, 4352 }
  0x9c   : > { %p631_p11 = scmp.ne.s32.totalorder %s960_s23, %s630_s11  ;;  %p635_p0 = scmp.lt.s32.totalorder %s960_s23, %s1007_s3 }
  0x9d   : > { %p636_p1 = scmp.lt.s32.totalorder %s634_s13, %s630_s11 }
  0x9e   : > { %p632_p12 = pnand %p631_p11, %p810_p4 }
  0x9f   : > { %p637_p2 = por %p636_p1, %p635_p0 }
  0xa0   : > { %p633_p13 = pneg %p632_p12 }
  0xa2   : > { %p638_p3 = pnand %p637_p2, %p633_p13 }
  0xa4   : > { %641 = shalt.err (!%p638_p3)
}
  0xa5   : > { %477 = dma.vmem_to_hbm [thread:$0]  (%p810_p4), %s373_s27, 256, %s960_s23, %s356_s16  }
  0xa6 PF: > { %p489_p5 = scmp.ge.s32.totalorder %s718_s22, 2  ;;  %s384_s5 = sand.u32 1, %s698_s18  }
  0xa7   : > { %s385_s8 = scalar_lea.sflag [#allocation6], %s384_s5 }
  0xa8   : > { %p484_p6 = pnand %p489_p5, %p817_p8 }
  0xaa   : > { %p485_p7 = pneg %p484_p6 }
  0xac   : > { %693 = dma.done.wait (%p485_p7), %s385_s8, 256  }
  0xad   : > { %695 = vsyncadd (%p485_p7), %s385_s8, 4294967040  ;;  %s23_s22 = sadd.s32 1, %s718_s22   ;;  %s1016_s18 = smov %s702_s19 }
  0xae   : > { %p20_p9 = scmp.ge.s32.totalorder %s23_s22, 19   ;;  %s1017_s19 = smov %s706_s20 }
  0xaf   : > { %s1018_s20 = smov %s823_s29  ;;  %s1019_s21 = smov %s714_s0 }
  0xb0   : > { %s1020_s0 = smov %s1022_s24  ;;  %22 = sbr.rel (!%p20_p9) target bundleno = 11 (0xb), region = 79 }
  0xb5   :  { %390 = vsyncpa [#allocation6], 1 }
  0xb6   :  { %392 = vsyncpa [#allocation6 + $0x1], 1 }
  0xb7   :  { %393 = vsyncpa [#allocation7], 1 }
  0xb8   :  { %395 = vsyncpa [#allocation7 + $0x1], 1 }

</bundles_post_ra>
